<compile_context>
chip_gen: v6e
topology: v6e:2x2x1
jax: 0.10.0
libtpu: 0.0.40
codegen_flags: <defaults>
</compile_context>

<pallas_src>
import functools

import jax
import jax.numpy as jnp
from jax import lax
from jax.experimental import pallas as pl
from jax.experimental.pallas import tpu as pltpu


def _round_up(x, m):
    return (x + m - 1) // m * m


def _round_down(x, m):
    return x // m * m


def _focal_from_ce(ce, alpha, gamma):
    """alpha * (1 - pt)**gamma * ce with pt = exp(-ce); NaN-safe."""
    pt = jnp.exp(-ce)
    q = jnp.maximum(1.0 - pt, 0.0)           # pt can round slightly above 1
    g = float(gamma)
    if g.is_integer() and g >= 0:
        w = lax.integer_pow(q, int(g))        # VALU multiplies, no log/exp
    else:
        w = q ** g
    return alpha * w * ce


# ----------------------------------------------------------------------------
# Path A: small class count (C <= 128).  Natural (N, C) HBM layout; in-kernel
# relayout to (C, block) so the batch rides the 128-lane axis and the exp /
# max / sum passes touch ~C/128 of the vregs the row layout would.
# ----------------------------------------------------------------------------
def _focal_kernel_lanes(logits_ref, tgt_ref, out_ref, lanes_ref, *,
                        alpha, gamma, n_valid, block):
    i = pl.program_id(0)
    _, C = logits_ref.shape

    x = logits_ref[...].astype(jnp.float32)                    # (blk, C)
    # Stage into the first C lanes of a 128-lane scratch, aligned XLU transpose,
    # slice back to C rows.  Lanes >= C hold stale garbage but are sliced away
    # before any arithmetic, so the scratch never needs zeroing.
    lanes_ref[:, :C] = x
    xt = lanes_ref[...].T[:C, :]                                # (C, blk) lane-dense
    t = tgt_ref[...]                                            # (1, blk) int32

    # numerically stable log-sum-exp over classes (sublane axis)
    m = jnp.max(xt, axis=0, keepdims=True)                      # (1, blk)
    xm = xt - m
    sumexp = jnp.sum(jnp.exp(xm), axis=0, keepdims=True)        # (1, blk)

    # gather (target logit - m) from the already-shifted logits (reuse xm)
    cls = lax.broadcasted_iota(jnp.int32, xt.shape, 0)
    tgt_shift = jnp.sum(jnp.where(cls == t, xm, 0.0), axis=0, keepdims=True)

    ce = jnp.log(sumexp) - tgt_shift                            # (1, blk)
    focal = _focal_from_ce(ce, alpha, gamma)

    last = pl.num_programs(0) - 1

    @pl.when(i < last)
    def _():
        out_ref[...] = focal

    @pl.when(i == last)                                         # ragged tail only
    def _():
        col = i * block + lax.broadcasted_iota(jnp.int32, focal.shape, 1)
        # keep the select (not a multiply-mask): garbage lanes may be NaN/Inf
        out_ref[...] = jnp.where(col < n_valid, focal, 0.0)


# ----------------------------------------------------------------------------
# Path B: larger class count (C > 128).  Classes already lane-dense; tile the
# batch on the sublane axis.  Output: per-sample focal column (blk, 1).
# ----------------------------------------------------------------------------
def _focal_kernel_rows(logits_ref, tgt_ref, out_ref, *, alpha, gamma,
                       n_valid, block):
    i = pl.program_id(0)
    x = logits_ref[...].astype(jnp.float32)                     # (blk, C)
    t = tgt_ref[...]                                            # (blk, 1)

    m = jnp.max(x, axis=-1, keepdims=True)                      # (blk, 1)
    xm = x - m
    sumexp = jnp.sum(jnp.exp(xm), axis=-1, keepdims=True)

    cls = lax.broadcasted_iota(jnp.int32, x.shape, 1)
    tgt_shift = jnp.sum(jnp.where(cls == t, xm, 0.0), axis=-1, keepdims=True)

    ce = jnp.log(sumexp) - tgt_shift                            # (blk, 1)
    focal = _focal_from_ce(ce, alpha, gamma)

    last = pl.num_programs(0) - 1

    @pl.when(i < last)
    def _():
        out_ref[...] = focal

    @pl.when(i == last)                                         # ragged tail only
    def _():
        row = i * block + lax.broadcasted_iota(jnp.int32, focal.shape, 0)
        out_ref[...] = jnp.where(row < n_valid, focal, 0.0)


_VMEM_WORKING_SET = 16 * 1024 * 1024    # per-step f32 intermediates target
_VMEM_LIMIT_BYTES = 32 * 1024 * 1024    # <= v7x scoped default; plenty for v5e/v6e


def focal_loss(logits, targets, *, alpha=1.0, gamma=2.0, reduction="mean",
               block=None):
    """Pallas focal loss. logits: (N, C) f32/bf16, targets: (N,) int in [0, C)."""
    N, C = logits.shape
    alpha = float(alpha)
    gamma = float(gamma)
    tgt = targets.astype(jnp.int32)
    itemsize = jnp.dtype(logits.dtype).itemsize

    if C <= 128:
        # ---- lane-dense path -------------------------------------------------
        # VMEM working-set per step: ~3 lane-padded relayout buffers
        # (block x 128 x 4B) + ~3 tile-shaped f32 intermediates + 2 double-
        # buffered input tiles.  (The relayout buffers, not the raw C-wide HBM
        # tile, are what bound `block` here.)
        if block is None:
            per_sample = 3 * 128 * 4 + 3 * C * 4 + 2 * C * itemsize
            block = _round_down(_VMEM_WORKING_SET // per_sample, 128)
            block = max(128, min(16384, block))
        block = max(128, _round_up(min(block, _round_up(N, 128)), 128))
        if block >= N and N > 128:             # >= 2 blocks so both v7x TCs work
            block = min(block, _round_up((N + 1) // 2, 128))
        grid = (pl.cdiv(N, block),)

        kernel = functools.partial(_focal_kernel_lanes, alpha=alpha,
                                   gamma=gamma, n_valid=N, block=block)
        per_sample_loss = pl.pallas_call(
            kernel,
            out_shape=jax.ShapeDtypeStruct((1, N), jnp.float32),
            grid_spec=pltpu.PrefetchScalarGridSpec(
                num_scalar_prefetch=0,
                grid=grid,
                in_specs=[
                    pl.BlockSpec((block, C), lambda i: (i, 0)),
                    pl.BlockSpec((1, block), lambda i: (0, i)),
                ],
                out_specs=pl.BlockSpec((1, block), lambda i: (0, i)),
                scratch_shapes=[pltpu.VMEM((block, 128), jnp.float32)],
            ),
            compiler_params=pltpu.CompilerParams(
                dimension_semantics=("parallel",),
                vmem_limit_bytes=_VMEM_LIMIT_BYTES),
        )(logits, tgt.reshape(1, N))
        per_sample_loss = per_sample_loss[0]                    # (N,)
    else:
        # ---- row path: classes already lane-dense ------------------------------
        # TODO(synk): vocab-scale C would need a second (arbitrary) grid axis over
        # C with an online log-sum-exp; not needed at these sizes.
        if block is None:
            per_sample = C * (3 * 4 + 2 * itemsize)
            block = _round_down(_VMEM_WORKING_SET // per_sample, 8)
            block = max(8, min(4096, block))
        block = max(8, _round_up(min(block, _round_up(N, 8)), 8))
        if block >= N and N > 8:               # >= 2 blocks so both v7x TCs work
            block = min(block, _round_up((N + 1) // 2, 8))
        grid = (pl.cdiv(N, block),)

        kernel = functools.partial(_focal_kernel_rows, alpha=alpha,
                                   gamma=gamma, n_valid=N, block=block)
        per_sample_loss = pl.pallas_call(
            kernel,
            out_shape=jax.ShapeDtypeStruct((N, 1), jnp.float32),
            grid_spec=pltpu.PrefetchScalarGridSpec(
                num_scalar_prefetch=0,
                grid=grid,
                in_specs=[
                    pl.BlockSpec((block, C), lambda i: (i, 0)),
                    pl.BlockSpec((block, 1), lambda i: (i, 0)),
                ],
                out_specs=pl.BlockSpec((block, 1), lambda i: (i, 0)),
            ),
            compiler_params=pltpu.CompilerParams(
                dimension_semantics=("parallel",),
                vmem_limit_bytes=_VMEM_LIMIT_BYTES),
        )(logits, tgt.reshape(N, 1))
        per_sample_loss = per_sample_loss[:, 0]                 # (N,)

    if reduction == "mean":
        return jnp.sum(per_sample_loss) / jnp.float32(N)
    elif reduction == "sum":
        return jnp.sum(per_sample_loss)
    else:  # 'none'
        return per_sample_loss


# ----------------------------------------------------------------------------
# Pure-JAX reference (mirrors the PyTorch module).
# ----------------------------------------------------------------------------
def _focal_loss_ref(logits, targets, alpha=1.0, gamma=2.0, reduction="mean"):
    logp = jax.nn.log_softmax(logits.astype(jnp.float32), axis=-1)
    ce = -jnp.take_along_axis(logp, targets[:, None].astype(jnp.int32),
                              axis=-1)[:, 0]
    pt = jnp.exp(-ce)
    focal = alpha * (1.0 - pt) ** gamma * ce
    if reduction == "mean":
        return jnp.mean(focal)
    elif reduction == "sum":
        return jnp.sum(focal)
    return focal


if __name__ == "__main__":
    key = jax.random.PRNGKey(0)
    k1, k2, k3, k4 = jax.random.split(key, 4)

    # Test 1: small class count (lane-dense path), ragged N (partial block).
    N1, C1 = 96, 10
    logits1 = jax.random.normal(k1, (N1, C1), dtype=jnp.float32)
    targets1 = jax.random.randint(k2, (N1,), 0, C1, dtype=jnp.int32)

    out_mean = jax.block_until_ready(
        focal_loss(logits1, targets1, alpha=1.0, gamma=2.0, reduction="mean"))
    ref_mean = _focal_loss_ref(logits1, targets1, 1.0, 2.0, "mean")
    assert jnp.allclose(out_mean, ref_mean, rtol=1e-5, atol=1e-5), (out_mean, ref_mean)

    out_none = jax.block_until_ready(
        focal_loss(logits1, targets1, alpha=0.25, gamma=2.0, reduction="none"))
    ref_none = _focal_loss_ref(logits1, targets1, 0.25, 2.0, "none")
    assert out_none.shape == (N1,)
    assert jnp.allclose(out_none, ref_none, rtol=1e-5, atol=1e-5)

    # Test 2: larger class count (row path), multi-block grid.
    N2, C2 = 32, 200
    logits2 = jax.random.normal(k3, (N2, C2), dtype=jnp.float32)
    targets2 = jax.random.randint(k4, (N2,), 0, C2, dtype=jnp.int32)

    out_sum = jax.block_until_ready(
        focal_loss(logits2, targets2, alpha=1.0, gamma=2.0, reduction="sum"))
    ref_sum = _focal_loss_ref(logits2, targets2, 1.0, 2.0, "sum")
    assert jnp.allclose(out_sum, ref_sum, rtol=1e-5, atol=1e-5), (out_sum, ref_sum)

    print("KERNEL_OK")
</pallas_src>

<mosaic_0001>
module attributes {stable_mosaic.version = 11 : i64} {
  func.func @_focal_kernel_lanes(%arg0: i32, %arg1: memref<128x10xf32, #tpu.memory_space<vmem>>, %arg2: memref<1x128xi32, #tpu.memory_space<vmem>>, %arg3: memref<1x128xf32, #tpu.memory_space<vmem>>, %arg4: memref<128x128xf32, #tpu.memory_space<vmem>>) attributes {dimension_semantics = [#tpu.dimension_semantics<parallel>], iteration_bounds = array<i64: 1>, scalar_prefetch = 0 : i64, scratch_operands = 1 : i64, tpu.core_type = #tpu.core_type<tc>, window_params = [{transform_indices = @transform_0, window_bounds = array<i64: 128, 10>}, {transform_indices = @transform_1, window_bounds = array<i64: 1, 128>}, {transform_indices = @transform_2, window_bounds = array<i64: 1, 128>}]} {
    %c0 = arith.constant 0 : index
    %c0_0 = arith.constant 0 : index
    %0 = vector.load %arg1[%c0, %c0_0] : memref<128x10xf32, #tpu.memory_space<vmem>>, vector<128x10xf32>
    %c0_1 = arith.constant 0 : index
    %c0_2 = arith.constant 0 : index
    %1 = vector.load %arg4[%c0_1, %c0_2] : memref<128x128xf32, #tpu.memory_space<vmem>>, vector<128x10xf32>
    tpu.vector_store %arg4[%c0_1, %c0_2], %0 {strides = array<i32>} : memref<128x128xf32, #tpu.memory_space<vmem>>, vector<128x10xf32>,
    %c0_3 = arith.constant 0 : index
    %c0_4 = arith.constant 0 : index
    %2 = vector.load %arg4[%c0_3, %c0_4] : memref<128x128xf32, #tpu.memory_space<vmem>>, vector<128x128xf32>
    %3 = tpu.transpose %2, [1, 0] : vector<128x128xf32> -> vector<128x128xf32>
    %4 = vector.extract_strided_slice %3 {offsets = [0, 0], sizes = [10, 128], strides = [1, 1]} : vector<128x128xf32> to vector<10x128xf32>
    %c0_5 = arith.constant 0 : index
    %c0_6 = arith.constant 0 : index
    %5 = vector.load %arg2[%c0_5, %c0_6] : memref<1x128xi32, #tpu.memory_space<vmem>>, vector<1x128xi32>
    %cst = arith.constant dense<0xFF800000> : vector<128xf32>
    %6 = vector.multi_reduction <maximumf>, %4, %cst [0] : vector<10x128xf32> to vector<128xf32>
    %7 = vector.shape_cast %6 : vector<128xf32> to vector<1x128xf32>
    %8 = vector.broadcast %7 : vector<1x128xf32> to vector<10x128xf32>
    %9 = arith.subf %4, %8 : vector<10x128xf32>
    %10 = math.exp %9 : vector<10x128xf32>
    %cst_7 = arith.constant dense<0.000000e+00> : vector<128xf32>
    %11 = vector.multi_reduction <add>, %10, %cst_7 [0] : vector<10x128xf32> to vector<128xf32>
    %12 = vector.shape_cast %11 : vector<128xf32> to vector<1x128xf32>
    %13 = tpu.iota {dimensions = array<i32: 0>} : vector<10x128xi32>
    %14 = vector.broadcast %5 : vector<1x128xi32> to vector<10x128xi32>
    %15 = arith.cmpi eq, %13, %14 : vector<10x128xi32>
    %cst_8 = arith.constant 0.000000e+00 : f32
    %16 = vector.broadcast %cst_8 : f32 to vector<10x128xf32>
    %17 = arith.select %15, %9, %16 : vector<10x128xi1>, vector<10x128xf32>
    %cst_9 = arith.constant dense<0.000000e+00> : vector<128xf32>
    %18 = vector.multi_reduction <add>, %17, %cst_9 [0] : vector<10x128xf32> to vector<128xf32>
    %19 = vector.shape_cast %18 : vector<128xf32> to vector<1x128xf32>
    %20 = math.log %12 : vector<1x128xf32>
    %21 = arith.subf %20, %19 : vector<1x128xf32>
    %cst_10 = arith.constant 0.000000e+00 : f32
    %22 = vector.broadcast %cst_10 : f32 to vector<1x128xf32>
    %23 = arith.subf %22, %21 : vector<1x128xf32>
    %24 = math.exp %23 : vector<1x128xf32>
    %cst_11 = arith.constant 1.000000e+00 : f32
    %25 = vector.broadcast %cst_11 : f32 to vector<1x128xf32>
    %26 = arith.subf %25, %24 : vector<1x128xf32>
    %cst_12 = arith.constant 0.000000e+00 : f32
    %27 = vector.broadcast %cst_12 : f32 to vector<1x128xf32>
    %28 = arith.maximumf %26, %27 : vector<1x128xf32>
    %29 = arith.mulf %28, %28 : vector<1x128xf32>
    %cst_13 = arith.constant 1.000000e+00 : f32
    %30 = vector.broadcast %cst_13 : f32 to vector<1x128xf32>
    %31 = arith.mulf %30, %29 : vector<1x128xf32>
    %32 = arith.mulf %31, %21 : vector<1x128xf32>
    %c0_i32 = arith.constant 0 : i32
    %33 = arith.cmpi slt, %arg0, %c0_i32 : i32
    %34 = arith.extui %33 : i1 to i32
    %c0_i32_14 = arith.constant 0 : i32
    %35 = arith.cmpi ne, %34, %c0_i32_14 : i32
    scf.if %35 {
      %c0_17 = arith.constant 0 : index
      %c0_18 = arith.constant 0 : index
      %39 = vector.load %arg3[%c0_17, %c0_18] : memref<1x128xf32, #tpu.memory_space<vmem>>, vector<1x128xf32>
      tpu.vector_store %arg3[%c0_17, %c0_18], %32 {strides = array<i32>} : memref<1x128xf32, #tpu.memory_space<vmem>>, vector<1x128xf32>,
    } else {
    }
    %c0_i32_15 = arith.constant 0 : i32
    %36 = arith.cmpi eq, %arg0, %c0_i32_15 : i32
    %37 = arith.extui %36 : i1 to i32
    %c0_i32_16 = arith.constant 0 : i32
    %38 = arith.cmpi ne, %37, %c0_i32_16 : i32
    scf.if %38 {
      %c128_i32 = arith.constant 128 : i32
      %39 = arith.muli %arg0, %c128_i32 : i32
      %40 = tpu.iota {dimensions = array<i32: 1>} : vector<1x128xi32>
      %41 = vector.broadcast %39 : i32 to vector<1x128xi32>
      %42 = arith.addi %41, %40 : vector<1x128xi32>
      %c96_i32 = arith.constant 96 : i32
      %43 = vector.broadcast %c96_i32 : i32 to vector<1x128xi32>
      %44 = arith.cmpi slt, %42, %43 : vector<1x128xi32>
      %cst_17 = arith.constant 0.000000e+00 : f32
      %45 = vector.broadcast %cst_17 : f32 to vector<1x128xf32>
      %46 = arith.select %44, %32, %45 : vector<1x128xi1>, vector<1x128xf32>
      %c0_18 = arith.constant 0 : index
      %c0_19 = arith.constant 0 : index
      %47 = vector.load %arg3[%c0_18, %c0_19] : memref<1x128xf32, #tpu.memory_space<vmem>>, vector<1x128xf32>
      tpu.vector_store %arg3[%c0_18, %c0_19], %46 {strides = array<i32>} : memref<1x128xf32, #tpu.memory_space<vmem>>, vector<1x128xf32>,
    } else {
    }
    return
  }
  func.func @transform_0(%arg0: i32) -> (i32, i32) {
    %c0_i32 = arith.constant 0 : i32
    %c0_i32_0 = arith.constant 0 : i32
    return %arg0, %c0_i32 : i32, i32
  }
  func.func @transform_1(%arg0: i32) -> (i32, i32) {
    %c0_i32 = arith.constant 0 : i32
    %c0_i32_0 = arith.constant 0 : i32
    return %c0_i32, %arg0 : i32, i32
  }
  func.func @transform_2(%arg0: i32) -> (i32, i32) {
    %c0_i32 = arith.constant 0 : i32
    %c0_i32_0 = arith.constant 0 : i32
    return %c0_i32, %arg0 : i32, i32
  }
}

</mosaic_0001>

<bundles_post_ra>
// kernel: tpu_custom_call.1
= control target key start
LH: loop header
LB: loop body
LE: loop exit
PB: predicated region body
PF: predicated region fallthrough
CT: control target
= control target key end

     0   :  { %vm28_vm0 = vcmask 80896   ;;  %s298_s0 = inlined_call_operand.vmem [shape: f32[96,10], index: 0, kind: input, shape index: {}]   ;;  %s299_s1 = inlined_call_operand.vmem [shape: s32[1,96], index: 1, kind: input, shape index: {}]   ;;  %s300_s2 = inlined_call_operand.hbm [shape: f32[1,96], index: 2, kind: output, shape index: {}]  }
   0x1   :  { %v12_v0 = vld [vmem:[%s298_s0] sm:$0xff]  ;;  %v13_v1 = vld [vmem:[%s298_s0 + $0x8] sm:$0xff]  ;;  %v14_v2 = vld [vmem:[%s298_s0 + $0x10] sm:$0xff] }
   0x2   :  { %29 = vst.msk [vmem:[#allocation2] sm:$0xff] %vm28_vm0, %v12_v0  ;;  %30 = vst.msk [vmem:[#allocation2 + $0x8] sm:$0xff] %vm28_vm0, %v13_v1  ;;  %v15_v3 = vld [vmem:[%s298_s0 + $0x18] sm:$0xff]  ;;  %v16_v4 = vld [vmem:[%s298_s0 + $0x20] sm:$0xff] }
   0x3   :  { %31 = vst.msk [vmem:[#allocation2 + $0x10] sm:$0xff] %vm28_vm0, %v14_v2  ;;  %v17_v5 = vld [vmem:[%s298_s0 + $0x28] sm:$0xff]  ;;  %32 = vst.msk [vmem:[#allocation2 + $0x18] sm:$0xff] %vm28_vm0, %v15_v3  ;;  %v18_v6 = vld [vmem:[%s298_s0 + $0x30] sm:$0xff] }
   0x4   :  { %33 = vst.msk [vmem:[#allocation2 + $0x20] sm:$0xff] %vm28_vm0, %v16_v4  ;;  %34 = vst.msk [vmem:[#allocation2 + $0x28] sm:$0xff] %vm28_vm0, %v17_v5  ;;  %v19_v7 = vld [vmem:[%s298_s0 + $0x38] sm:$0xff]  ;;  %v20_v8 = vld [vmem:[%s298_s0 + $0x40] sm:$0xff] }
   0x5   :  { %35 = vst.msk [vmem:[#allocation2 + $0x30] sm:$0xff] %vm28_vm0, %v18_v6  ;;  %36 = vst.msk [vmem:[#allocation2 + $0x38] sm:$0xff] %vm28_vm0, %v19_v7  ;;  %v21_v9 = vld [vmem:[%s298_s0 + $0x48] sm:$0xff]  ;;  %v22_v10 = vld [vmem:[%s298_s0 + $0x50] sm:$0xff] }
   0x6   :  { %37 = vst.msk [vmem:[#allocation2 + $0x40] sm:$0xff] %vm28_vm0, %v20_v8  ;;  %v23_v11 = vld [vmem:[%s298_s0 + $0x58] sm:$0xff]  ;;  %38 = vst.msk [vmem:[#allocation2 + $0x48] sm:$0xff] %vm28_vm0, %v21_v9  ;;  %v24_v12 = vld [vmem:[%s298_s0 + $0x60] sm:$0xff] }
   0x7   :  { %39 = vst.msk [vmem:[#allocation2 + $0x50] sm:$0xff] %vm28_vm0, %v22_v10  ;;  %40 = vst.msk [vmem:[#allocation2 + $0x58] sm:$0xff] %vm28_vm0, %v23_v11  ;;  %v25_v13 = vld [vmem:[%s298_s0 + $0x68] sm:$0xff]  ;;  %v26_v14 = vld [vmem:[%s298_s0 + $0x70] sm:$0xff] }
   0x8   :  { %41 = vst.msk [vmem:[#allocation2 + $0x60] sm:$0xff] %vm28_vm0, %v24_v12  ;;  %42 = vst.msk [vmem:[#allocation2 + $0x68] sm:$0xff] %vm28_vm0, %v25_v13  ;;  %v27_v15 = vld [vmem:[%s298_s0 + $0x78] sm:$0xff] }
   0x9   :  { %43 = vst.msk [vmem:[#allocation2 + $0x70] sm:$0xff] %vm28_vm0, %v26_v14 }
   0xa   :  { %7 = vsyncpa [#allocation4], 0  ;;  %44 = vst.msk [vmem:[#allocation2 + $0x78] sm:$0xff] %vm28_vm0, %v27_v15  ;;  %v45_v16 = vld [vmem:[#allocation2] sm:$0xff]  ;;  %v46_v17 = vld [vmem:[#allocation2 + $0x8] sm:$0xff]  ;;  %vm94_vm1 = vcmask 1041408   ;;  %v117_v46 = vlaneseq }
   0xb   :  { %61 = vxpose.xlu0.b32.start [1/16] (narrow) %v45_v16, 16  ;;  %v47_v18 = vld [vmem:[#allocation2 + $0x10] sm:$0xff]  ;;  %v48_v19 = vld [vmem:[#allocation2 + $0x18] sm:$0xff]  ;;  %v49_v20 = vld [vmem:[#allocation2 + $0x20] sm:$0xff] }
   0xc   :  { %v50_v21 = vld [vmem:[#allocation2 + $0x28] sm:$0xff]  ;;  %v51_v22 = vld [vmem:[#allocation2 + $0x30] sm:$0xff]  ;;  %v52_v23 = vld [vmem:[#allocation2 + $0x38] sm:$0xff]  ;;  %v118_v47 = vshrl.u32 %v117_v46, 7  ;;  %v157_v13 = vand.u32 127, %v117_v46 }
   0xd   :  { %v53_v24 = vld [vmem:[#allocation2 + $0x40] sm:$0xff]  ;;  %v54_v25 = vld [vmem:[#allocation2 + $0x48] sm:$0xff] }
   0xe   :  { %v55_v26 = vld [vmem:[#allocation2 + $0x50] sm:$0xff]  ;;  %v56_v27 = vld [vmem:[#allocation2 + $0x58] sm:$0xff]  ;;  %v119_v48 = vadd.s32 8, %v118_v47  ;;  %v177_v49 = vld [vmem:[%s299_s1] ss:$0 sm:$0xff]  ;;  %s209_s1 = smov [#allocation3]  }
   0xf   :  { %62 = vxpose.xlu0.b32.cont [2/16] (narrow) %v46_v17, 16  ;;  %v57_v28 = vld [vmem:[#allocation2 + $0x60] sm:$0xff]  ;;  %v58_v29 = vld [vmem:[#allocation2 + $0x68] sm:$0xff]  ;;  %vm124_vm3 = vcmp.eq.s32.totalorder %v118_v47, %v177_v49  ;;  %s169_s14 = sshll.u32 %s209_s1, 4  ;;  %vm160_vm4 = vcmp.lt.s32.totalorder %v157_v13, 96  ;;  %s170_s14 = int_to_ptr.vmem [resolvable:$true] %s169_s14 }
  0x10   :  { %v59_v30 = vld [vmem:[#allocation2 + $0x70] sm:$0xff]  ;;  %vm125_vm2 = vcmp.eq.s32.totalorder %v119_v48, %v177_v49  ;;  %s187_s15 = scalar_lea.vmem %s170_s14, 16  ;;  %s191_s16 = scalar_lea.vmem %s170_s14, 32 }
  0x11   :  { %v60_v31 = vld [vmem:[#allocation2 + $0x78] sm:$0xff]  ;;  %p188_p0 = scmp.ne.s32.totalorder %s170_s14, %s187_s15  ;;  %p192_p1 = scmp.lt.s32.totalorder %s170_s14, %s170_s14 }
  0x12   :  { %p193_p2 = scmp.lt.s32.totalorder %s191_s16, %s187_s15 }
  0x13   :  { %63 = vxpose.xlu0.b32.cont [3/16] (narrow) %v47_v18, 16 }
  0x14   :  { %p194_p3 = por %p193_p2, %p192_p1 }
  0x16   :  { %p195_p4 = pnand %p194_p3, %p188_p0 }
  0x17   :  { %64 = vxpose.xlu0.b32.cont [4/16] (narrow) %v48_v19, 16 }
  0x1b   :  { %65 = vxpose.xlu0.b32.cont [5/16] (narrow) %v49_v20, 16 }
  0x1f   :  { %66 = vxpose.xlu0.b32.cont [6/16] (narrow) %v50_v21, 16 }
  0x23   :  { %67 = vxpose.xlu0.b32.cont [7/16] (narrow) %v51_v22, 16 }
  0x27   :  { %68 = vxpose.xlu0.b32.cont [8/16] (narrow) %v52_v23, 16 }
  0x2b   :  { %69 = vxpose.xlu0.b32.cont [9/16] (narrow) %v53_v24, 16 }
  0x2f   :  { %70 = vxpose.xlu0.b32.cont [10/16] (narrow) %v54_v25, 16 }
  0x33   :  { %71 = vxpose.xlu0.b32.cont [11/16] (narrow) %v55_v26, 16 }
  0x37   :  { %72 = vxpose.xlu0.b32.cont [12/16] (narrow) %v56_v27, 16 }
  0x3b   :  { %73 = vxpose.xlu0.b32.cont [13/16] (narrow) %v57_v28, 16 }
  0x3f   :  { %74 = vxpose.xlu0.b32.cont [14/16] (narrow) %v58_v29, 16 }
  0x43   :  { %75 = vxpose.xlu0.b32.cont [15/16] (narrow) %v59_v30, 16 }
  0x47   :  { %76 = vxpose.xlu0.b32.end [16/16] (narrow) %v60_v31, 16 }
  0x87   :  { %v77_v32 = vpop.trf.xlu0 }
  0x8b   :  { %v78_v33 = vpop.trf.xlu0 }
  0x8c   :  { %v95_v34 = vsel %vm94_vm1, %v78_v33, -inf }
  0x8d   :  { %v96_v35 = vmax.f32 %v77_v32, %v95_v34 }
  0x8f   :  { %v97_v36 = vrot.slane %v96_v35, 4 }
  0x91   :  { %v98_v37 = vmax.f32 %v96_v35, %v97_v36 }
  0x93   :  { %v99_v38 = vrot.slane %v98_v37, 2 }
  0x95   :  { %v100_v39 = vmax.f32 %v98_v37, %v99_v38 }
  0x97   :  { %v101_v40 = vrot.slane %v100_v39, 1 }
  0x99   :  { %v102_v41 = vmax.f32 %v100_v39, %v101_v40 }
  0x9b   :  { %v103_v42 = vsub.f32 %v77_v32, %v102_v41  ;;  %v104_v43 = vsub.f32 %v78_v33, %v102_v41 }
  0x9d   :  { %v105_v44 = vmul.f32 1.442695, %v103_v42  ;;  %v107_v45 = vmul.f32 1.442695, %v104_v43  ;;  %v127_v52 = vsel %vm125_vm2, %v104_v43, 0.0  ;;  %v126_v55 = vsel %vm124_vm3, %v103_v42, 0.0 }
  0x9e   :  { %v128_v56 = vsel %vm94_vm1, %v127_v52, 0.0 }
  0x9f   :  { %179 = vpow2.f32 %v105_v44  ;;  %v129_v59 = vadd.f32 %v128_v56, %v126_v55 }
  0xa0   :  { %181 = vpow2.f32 %v107_v45 }
  0xa1   :  { %v130_v62 = vrot.slane %v129_v59, 4 }
  0xa3   :  { %v131_v0 = vadd.f32 %v130_v62, %v129_v59 }
  0xa5   :  { %v132_v2 = vrot.slane %v131_v0, 2 }
  0xa7   :  { %v133_v3 = vadd.f32 %v132_v2, %v131_v0 }
  0xa9   :  { %v134_v4 = vrot.slane %v133_v3, 1 }
  0xab   :  { %v135_v6 = vadd.f32 %v134_v4, %v133_v3 }
  0xac   :  { %v180_v50 = vpop.eup %179 }
  0xad   :  { %v182_v51 = vpop.eup %181 }
  0xae   :  { %v109_v53 = vsel %vm94_vm1, %v182_v51, 0.0 }
  0xaf   :  { %v110_v54 = vadd.f32 %v180_v50, %v109_v53 }
  0xb1   :  { %v111_v57 = vrot.slane %v110_v54, 4 }
  0xb3   :  { %v112_v58 = vadd.f32 %v111_v57, %v110_v54 }
  0xb5   :  { %v113_v60 = vrot.slane %v112_v58, 2 }
  0xb7   :  { %v114_v61 = vadd.f32 %v113_v60, %v112_v58 }
  0xb9   :  { %v115_v63 = vrot.slane %v114_v61, 1 }
  0xbb   :  { %v116_v1 = vadd.f32 %v115_v63, %v114_v61 }
  0xbd   :  { %183 = vlog2.f32 %v116_v1 }
  0xca   :  { %v184_v5 = vpop.eup %183 }
  0xcb   :  { %v137_v7 = vmul.f32 0.6931472, %v184_v5 }
  0xcd   :  { %v138_v8 = vsub.f32 %v137_v7, %v135_v6 }
  0xcf   :  { %v139_v9 = vsub.f32 0.0, %v138_v8 }
  0xd1   :  { %v140_v10 = vmul.f32 1.442695, %v139_v9 }
  0xd3   :  { %185 = vpow2.f32 %v140_v10 }
  0xe0   :  { %v186_v11 = vpop.eup %185 }
  0xe1   :  { %v142_v12 = vsub.f32 1.0, %v186_v11 }
  0xe3   :  { %v143_v14 = vmax.f32 %v142_v12, 0.0 }
  0xe5   :  { %v144_v15 = vmul.f32 %v143_v14, %v143_v14 }
  0xe7   :  { %v145_v16 = vmul.f32 %v144_v15, %v138_v8 }
  0xe9   :  { %v161_v17 = vsel %vm160_vm4, %v145_v16, 0.0 }
  0xea   :  { %162 = vst [vmem:[#allocation3] sm:$0x1] %v161_v17 }
  0xeb   :  { %198 = shalt.err (!%p195_p4)
}
  0xec   :  { %172 = dma.vmem_to_hbm [thread:$0]  %s170_s14, 16, %s300_s2, [#allocation4]  }
  0xed   :  { %207 = dma.done.wait [#allocation4], 16  }
  0xee   :  { %208 = vsyncadd [#allocation4], 4294967280 }
  0xef   :  { %176 = vsyncpa [#allocation4], 1 }

</bundles_post_ra>
